<compile_context>
chip_gen: v7x
topology: tpu7x:2x2x1
jax: 0.10.0
libtpu: 0.0.40
codegen_flags: <defaults>
</compile_context>

<pallas_src>
from functools import partial

import jax
import jax.numpy as jnp
from jax.experimental import pallas as pl
from jax.experimental.pallas import tpu as pltpu


_VMEM_SPEC = pl.BlockSpec(memory_space=pltpu.MemorySpace.VMEM)
_LANE = 128
_TARGET_BLOCK_ELEMS = 512 * 1024          # ~2 MiB f32 per elementwise block
_VMEM_LIMIT = 32 * 1024 * 1024


# ---------------------------------------------------------------------------
# Pallas kernels (hot paths)
# ---------------------------------------------------------------------------

def _conf_blend_kernel(p_ref, a_ref, yb_ref):
    """Fused ConfidenceMaskModule + blend base:
       A = |2p - 1|, Y_base = A * p  (== A*p + (1-A)*0 at non-refined pixels)."""
    p = p_ref[...]
    a = jnp.abs(2.0 * p - 1.0)
    a_ref[...] = a
    yb_ref[...] = a * p


def _point_head_kernel(feats_ref, w1_ref, b1_ref, w2_ref, b2_ref,
                       logit_ref, prob_ref):
    """PointHead: fused 2-layer MLP over all points, sigmoid in the epilogue.
       Hidden dim and output dim are lane-padded to 128; only column 0 of the
       outputs is meaningful."""
    h = jnp.dot(feats_ref[...], w1_ref[...],
                preferred_element_type=jnp.float32) + b1_ref[...]
    h = jnp.maximum(h, 0.0)
    logits = jnp.dot(h, w2_ref[...],
                     preferred_element_type=jnp.float32) + b2_ref[...]
    logit_ref[...] = logits
    prob_ref[...] = jax.nn.sigmoid(logits)


# ---------------------------------------------------------------------------
# Pallas wrappers
# ---------------------------------------------------------------------------

def _plan_elementwise_shape(total):
    """Factor `total` into (rows, cols) with cols a multiple of 128 (lane- and
    sublane-dense layout). Returns None if no clean factorization exists."""
    for cols in (1024, 512, 256, 128):
        if total % cols == 0:
            return total // cols, cols
    return None


def confidence_blend_pallas(p_flat):
    """p_flat: (B, HW) f32 -> (A, Y_base) each (B, HW) f32, single HBM pass."""
    b, hw = p_flat.shape
    total = b * hw
    plan = _plan_elementwise_shape(total)
    if plan is None:
        # TODO(synk): ragged sizes take a padded-copy fallback; typical image
        # sizes (multiples of 128) use the copy-free path above.
        pad = (-total) % (8 * _LANE)
        p2 = jnp.pad(p_flat.reshape(-1), (0, pad)).reshape(-1, _LANE)
        rows, cols = p2.shape
    else:
        rows, cols = plan
        pad = 0
        p2 = p_flat.reshape(rows, cols)

    # Tile over rows with ~2 MiB blocks; keep >= 2 grid steps when there is
    # enough work so the HW axis can split across v7x's two TensorCores.
    if rows <= 8:
        tile_rows = rows
    else:
        tile_rows = min(rows, max(8, (_TARGET_BLOCK_ELEMS // cols) // 8 * 8))
        if tile_rows >= rows and rows >= 16:
            tile_rows = ((rows // 2 + 7) // 8) * 8

    grid = (pl.cdiv(rows, tile_rows),)
    spec = pl.BlockSpec((tile_rows, cols), lambda i: (i, 0))
    shape = jax.ShapeDtypeStruct((rows, cols), p_flat.dtype)
    nbytes = 3 * total * p_flat.dtype.itemsize  # read p, write A, write Y_base

    a2, yb2 = pl.pallas_call(
        _conf_blend_kernel,
        out_shape=(shape, shape),
        grid=grid,
        in_specs=[spec],
        out_specs=(spec, spec),
        compiler_params=pltpu.CompilerParams(
            dimension_semantics=("parallel",),     # only helps on multi-TC v7x
            vmem_limit_bytes=_VMEM_LIMIT),
        cost_estimate=pl.CostEstimate(
            flops=4 * total, transcendentals=0, bytes_accessed=nbytes),
    )(p2)

    if pad:
        a_flat = a2.reshape(-1)[:total].reshape(b, hw)
        yb_flat = yb2.reshape(-1)[:total].reshape(b, hw)
    else:
        a_flat = a2.reshape(b, hw)
        yb_flat = yb2.reshape(b, hw)
    return a_flat, yb_flat


def prepare_point_head_params(params):
    """Lane-pad the PointHead weights ONCE (hidden -> 128, output -> 128) so the
    per-call Pallas MLP sees MXU-native shapes and stores are unmasked."""
    c, hidden = params["w1"].shape
    h_pad = max(_LANE, ((hidden + _LANE - 1) // _LANE) * _LANE)
    w1_p = jnp.zeros((c, h_pad), jnp.float32).at[:, :hidden].set(params["w1"])
    b1_p = jnp.zeros((1, h_pad), jnp.float32).at[:, :hidden].set(params["b1"])
    w2_p = jnp.zeros((h_pad, _LANE), jnp.float32).at[:hidden, :1].set(params["w2"])
    b2_p = jnp.zeros((1, _LANE), jnp.float32).at[:, :1].set(params["b2"])
    return {"w1": w1_p, "b1": b1_p, "w2": w2_p, "b2": b2_p}


def point_head_pallas(feats, ph_params):
    """feats: (N, C) f32 -> (logits (N,), probs (N,)) via one fused MLP call."""
    n, c = feats.shape
    n_pad = max(8, ((n + 7) // 8) * 8)                      # sublane-aligned rows
    feats_p = jnp.zeros((n_pad, c), feats.dtype).at[:n].set(feats)
    out_shape = jax.ShapeDtypeStruct((n_pad, _LANE), jnp.float32)
    logit_p, prob_p = pl.pallas_call(
        _point_head_kernel,
        out_shape=(out_shape, out_shape),
        in_specs=[_VMEM_SPEC] * 5,
        out_specs=(_VMEM_SPEC, _VMEM_SPEC),
        compiler_params=pltpu.CompilerParams(vmem_limit_bytes=_VMEM_LIMIT),
    )(feats_p, ph_params["w1"], ph_params["b1"], ph_params["w2"], ph_params["b2"])
    return logit_p[:n, 0], prob_p[:n, 0]


# ---------------------------------------------------------------------------
# Point selection helpers (approx top-k on realistic sizes, exact fallback)
# ---------------------------------------------------------------------------

def _top_idx_max(x, k):
    # TODO(synk): top-k selection has no clean Pallas TPU equivalent; use the
    # TPU ApproxTopK custom call for realistic sizes, exact top_k for tiny ones.
    if x.shape[-1] >= max(2048, 8 * k):
        return jax.lax.approx_max_k(x, k, recall_target=0.95,
                                    aggregate_to_topk=True)[1]
    return jax.lax.top_k(x, k)[1]


def _top_idx_min(x, k):
    if x.shape[-1] >= max(2048, 8 * k):
        return jax.lax.approx_min_k(x, k, recall_target=0.95,
                                    aggregate_to_topk=True)[1]
    return jax.lax.top_k(-x, k)[1]


# ---------------------------------------------------------------------------
# Forward pass (module glue: batched selection / gather / scatter, jitted)
# ---------------------------------------------------------------------------

@partial(jax.jit, static_argnames=("top_k", "top_l", "top_i"))
def point_refiner_forward(p_coarse_mask, feature_map, ph_params,
                          top_k=32, top_l=16, top_i=16):
    B, _, H, W = p_coarse_mask.shape
    HW = H * W
    C = feature_map.shape[1]
    n_total = top_k + top_l + top_i

    p_flat = p_coarse_mask.reshape(B, HW)

    # Fused ConfidenceMaskModule math + blend base (single HBM pass each way).
    a_flat, y_base_flat = confidence_blend_pallas(p_flat)

    # --- Point selection, batched over B (A_unc never materialized) ---------
    idx_k = _top_idx_min(a_flat, top_k)       # CMM: most uncertain (min A)
    idx_l = _top_idx_max(p_flat, top_l)       # PCM: most foreground-like
    idx_i = _top_idx_min(p_flat, top_i)       # PCM: most background-like
    flat_idx = jnp.concatenate([idx_k, idx_l, idx_i], axis=1).astype(jnp.int32)
    coords = jnp.stack([flat_idx // W, flat_idx % W], axis=-1)        # (B, N, 2)

    # --- PointFeatureExtractor: gather from NATIVE (B, C, HW) layout --------
    fm_flat = feature_map.reshape(B, C, HW)
    pf_cn = jnp.take_along_axis(fm_flat, flat_idx[:, None, :], axis=2)  # (B,C,N)
    point_feats = jnp.transpose(pf_cn, (0, 2, 1))                       # (B,N,C)

    # --- PointHead: ONE batched MLP over all B*N points ---------------------
    logits_flat, probs_flat = point_head_pallas(
        point_feats.reshape(B * n_total, C), ph_params)
    logits = logits_flat.reshape(B, n_total, 1)
    probs = probs_flat.reshape(B, n_total)

    # --- Blend only at the selected points (tiny batched scatter) -----------
    # Y_u = A*p + (1-A)*Y_refined; off-point pixels already hold A*p (Y_base),
    # so only the N selected points per batch are overwritten.
    # TODO(synk): scatter kept in plain JAX (jitted so XLA can do it in place);
    # a Pallas aliased-scatter kernel would need dynamic-lane masked stores.
    a_pt = jnp.take_along_axis(a_flat, flat_idx, axis=1)
    p_pt = jnp.take_along_axis(p_flat, flat_idx, axis=1)
    blended = a_pt * p_pt + (1.0 - a_pt) * probs
    global_idx = (flat_idx
                  + jnp.arange(B, dtype=flat_idx.dtype)[:, None] * HW).reshape(-1)
    y_u_flat = y_base_flat.reshape(-1).at[global_idx].set(blended.reshape(-1))
    Y_u = jax.lax.stop_gradient(y_u_flat.reshape(B, 1, H, W))

    # (Y_coarse_bin in the reference is computed but never used -> omitted.)

    A = a_flat.reshape(B, 1, H, W)
    return A, Y_u, coords, logits


# ---------------------------------------------------------------------------
# Example run
# ---------------------------------------------------------------------------

if __name__ == "__main__":
    key = jax.random.PRNGKey(0)
    k_in, k_feat, k_w1, k_w2 = jax.random.split(key, 4)

    B, C, H, W = 2, 8, 16, 16
    HIDDEN = 32
    TOP_K, TOP_L, TOP_I = 32, 16, 16   # scaled-down versions of 512/128/128
    N_TOTAL = TOP_K + TOP_L + TOP_I

    p_coarse_mask = jax.nn.sigmoid(
        jax.random.normal(k_in, (B, 1, H, W), jnp.float32))
    feature_map = jax.random.normal(k_feat, (B, C, H, W), jnp.float32)

    # Deterministic PointHead parameters (C -> HIDDEN -> 1 MLP); lane-pad once.
    raw_params = {
        "w1": 0.1 * jax.random.normal(k_w1, (C, HIDDEN), jnp.float32),
        "b1": jnp.zeros((1, HIDDEN), jnp.float32),
        "w2": 0.1 * jax.random.normal(k_w2, (HIDDEN, 1), jnp.float32),
        "b2": jnp.zeros((1, 1), jnp.float32),
    }
    ph_params = prepare_point_head_params(raw_params)

    A, Y_u, point_coords, logits = point_refiner_forward(
        p_coarse_mask, feature_map, ph_params,
        top_k=TOP_K, top_l=TOP_L, top_i=TOP_I)
    jax.block_until_ready((A, Y_u, point_coords, logits))

    # ---- Sanity checks ------------------------------------------------------
    assert A.shape == (B, 1, H, W)
    assert Y_u.shape == (B, 1, H, W)
    assert point_coords.shape == (B, N_TOTAL, 2)
    assert logits.shape == (B, N_TOTAL, 1)

    a_ref = jnp.abs(2.0 * p_coarse_mask - 1.0)
    assert jnp.allclose(A, a_ref, atol=1e-6, rtol=1e-6)

    # PointHead + gather reference (plain JAX, unpadded weights).
    flat_idx_h = point_coords[..., 0] * W + point_coords[..., 1]          # (B,N)
    fm_flat_h = feature_map.reshape(B, C, H * W)
    pf_h = jnp.take_along_axis(fm_flat_h, flat_idx_h[:, None, :], axis=2)
    pf_h = jnp.transpose(pf_h, (0, 2, 1)).reshape(B * N_TOTAL, C)
    h_h = jnp.maximum(pf_h @ raw_params["w1"] + raw_params["b1"], 0.0)
    logits_ref = (h_h @ raw_params["w2"] + raw_params["b2"]).reshape(B, N_TOTAL, 1)
    assert jnp.allclose(logits, logits_ref, atol=5e-3, rtol=5e-3)

    # Blend/scatter reference for Y_u (uses the kernel's own logits).
    p_flat_h = p_coarse_mask.reshape(B, -1)
    a_flat_h = jnp.abs(2.0 * p_flat_h - 1.0)
    prob_h = jax.nn.sigmoid(logits[..., 0])
    y_ref = a_flat_h * p_flat_h
    for b in range(B):
        a_b = a_flat_h[b, flat_idx_h[b]]
        p_b = p_flat_h[b, flat_idx_h[b]]
        y_ref = y_ref.at[b, flat_idx_h[b]].set(a_b * p_b + (1.0 - a_b) * prob_h[b])
    assert jnp.allclose(Y_u.reshape(B, -1), y_ref, atol=1e-5, rtol=1e-5)

    print("KERNEL_OK")
</pallas_src>

<mosaic_0001>
module attributes {stable_mosaic.version = 11 : i64} {
  func.func @_conf_blend_kernel(%arg0: i32, %arg1: memref<1x512xf32, #tpu.memory_space<vmem>>, %arg2: memref<1x512xf32, #tpu.memory_space<vmem>>, %arg3: memref<1x512xf32, #tpu.memory_space<vmem>>) attributes {dimension_semantics = [#tpu.dimension_semantics<parallel>], iteration_bounds = array<i64: 1>, scalar_prefetch = 0 : i64, scratch_operands = 0 : i64, tpu.core_type = #tpu.core_type<tc>, window_params = [{transform_indices = @transform_0, window_bounds = array<i64: 1, 512>}, {transform_indices = @transform_1, window_bounds = array<i64: 1, 512>}, {transform_indices = @transform_2, window_bounds = array<i64: 1, 512>}]} {
    %c0 = arith.constant 0 : index
    %c0_0 = arith.constant 0 : index
    %0 = vector.load %arg1[%c0, %c0_0] : memref<1x512xf32, #tpu.memory_space<vmem>>, vector<1x512xf32>
    %cst = arith.constant 2.000000e+00 : f32
    %1 = vector.broadcast %cst : f32 to vector<1x512xf32>
    %2 = arith.mulf %1, %0 : vector<1x512xf32>
    %cst_1 = arith.constant 1.000000e+00 : f32
    %3 = vector.broadcast %cst_1 : f32 to vector<1x512xf32>
    %4 = arith.subf %2, %3 : vector<1x512xf32>
    %5 = math.absf %4 : vector<1x512xf32>
    %c0_2 = arith.constant 0 : index
    %c0_3 = arith.constant 0 : index
    %6 = vector.load %arg2[%c0_2, %c0_3] : memref<1x512xf32, #tpu.memory_space<vmem>>, vector<1x512xf32>
    tpu.vector_store %arg2[%c0_2, %c0_3], %5 {strides = array<i32>} : memref<1x512xf32, #tpu.memory_space<vmem>>, vector<1x512xf32>,
    %7 = arith.mulf %5, %0 : vector<1x512xf32>
    %c0_4 = arith.constant 0 : index
    %c0_5 = arith.constant 0 : index
    %8 = vector.load %arg3[%c0_4, %c0_5] : memref<1x512xf32, #tpu.memory_space<vmem>>, vector<1x512xf32>
    tpu.vector_store %arg3[%c0_4, %c0_5], %7 {strides = array<i32>} : memref<1x512xf32, #tpu.memory_space<vmem>>, vector<1x512xf32>,
    return
  }
  func.func @transform_0(%arg0: i32) -> (i32, i32) {
    %c0_i32 = arith.constant 0 : i32
    %c0_i32_0 = arith.constant 0 : i32
    return %arg0, %c0_i32 : i32, i32
  }
  func.func @transform_1(%arg0: i32) -> (i32, i32) {
    %c0_i32 = arith.constant 0 : i32
    %c0_i32_0 = arith.constant 0 : i32
    return %arg0, %c0_i32 : i32, i32
  }
  func.func @transform_2(%arg0: i32) -> (i32, i32) {
    %c0_i32 = arith.constant 0 : i32
    %c0_i32_0 = arith.constant 0 : i32
    return %arg0, %c0_i32 : i32, i32
  }
}

module attributes {stable_mosaic.version = 11 : i64} {
  func.func @_point_head_kernel(%arg0: memref<128x8xf32, #tpu.memory_space<vmem>>, %arg1: memref<8x128xf32, #tpu.memory_space<vmem>>, %arg2: memref<1x128xf32, #tpu.memory_space<vmem>>, %arg3: memref<128x128xf32, #tpu.memory_space<vmem>>, %arg4: memref<1x128xf32, #tpu.memory_space<vmem>>, %arg5: memref<128x128xf32, #tpu.memory_space<vmem>>, %arg6: memref<128x128xf32, #tpu.memory_space<vmem>>) attributes {dimension_semantics = [], scalar_prefetch = 0 : i64, scratch_operands = 0 : i64, tpu.core_type = #tpu.core_type<tc>} {
    %c0 = arith.constant 0 : index
    %c0_0 = arith.constant 0 : index
    %0 = vector.load %arg0[%c0, %c0_0] : memref<128x8xf32, #tpu.memory_space<vmem>>, vector<128x8xf32>
    %c0_1 = arith.constant 0 : index
    %c0_2 = arith.constant 0 : index
    %1 = vector.load %arg1[%c0_1, %c0_2] : memref<8x128xf32, #tpu.memory_space<vmem>>, vector<8x128xf32>
    %cst = arith.constant dense<0.000000e+00> : vector<128x128xf32>
    %2 = tpu.matmul %0, %1, %cst {dimension_numbers = #tpu.dot_dimension_numbers<[1], [0], [0], [1], [0, 0, 1, 1], [], []>} : vector<128x8xf32>, vector<8x128xf32>, vector<128x128xf32> -> vector<128x128xf32>
    %c0_3 = arith.constant 0 : index
    %c0_4 = arith.constant 0 : index
    %3 = vector.load %arg2[%c0_3, %c0_4] : memref<1x128xf32, #tpu.memory_space<vmem>>, vector<1x128xf32>
    %4 = vector.broadcast %3 : vector<1x128xf32> to vector<128x128xf32>
    %5 = arith.addf %2, %4 : vector<128x128xf32>
    %cst_5 = arith.constant 0.000000e+00 : f32
    %6 = vector.broadcast %cst_5 : f32 to vector<128x128xf32>
    %7 = arith.maximumf %5, %6 : vector<128x128xf32>
    %c0_6 = arith.constant 0 : index
    %c0_7 = arith.constant 0 : index
    %8 = vector.load %arg3[%c0_6, %c0_7] : memref<128x128xf32, #tpu.memory_space<vmem>>, vector<128x128xf32>
    %cst_8 = arith.constant dense<0.000000e+00> : vector<128x128xf32>
    %9 = tpu.matmul %7, %8, %cst_8 {dimension_numbers = #tpu.dot_dimension_numbers<[1], [0], [0], [1], [0, 0, 1, 1], [], []>} : vector<128x128xf32>, vector<128x128xf32>, vector<128x128xf32> -> vector<128x128xf32>
    %c0_9 = arith.constant 0 : index
    %c0_10 = arith.constant 0 : index
    %10 = vector.load %arg4[%c0_9, %c0_10] : memref<1x128xf32, #tpu.memory_space<vmem>>, vector<1x128xf32>
    %11 = vector.broadcast %10 : vector<1x128xf32> to vector<128x128xf32>
    %12 = arith.addf %9, %11 : vector<128x128xf32>
    %c0_11 = arith.constant 0 : index
    %c0_12 = arith.constant 0 : index
    %13 = vector.load %arg5[%c0_11, %c0_12] : memref<128x128xf32, #tpu.memory_space<vmem>>, vector<128x128xf32>
    tpu.vector_store %arg5[%c0_11, %c0_12], %12 {strides = array<i32>} : memref<128x128xf32, #tpu.memory_space<vmem>>, vector<128x128xf32>,
    %14 = arith.negf %12 : vector<128x128xf32>
    %15 = math.exp %14 : vector<128x128xf32>
    %cst_13 = arith.constant 1.000000e+00 : f32
    %16 = vector.broadcast %cst_13 : f32 to vector<128x128xf32>
    %17 = arith.addf %16, %15 : vector<128x128xf32>
    %18 = arith.divf %16, %17 : vector<128x128xf32>
    %c0_14 = arith.constant 0 : index
    %c0_15 = arith.constant 0 : index
    %19 = vector.load %arg6[%c0_14, %c0_15] : memref<128x128xf32, #tpu.memory_space<vmem>>, vector<128x128xf32>
    tpu.vector_store %arg6[%c0_14, %c0_15], %18 {strides = array<i32>} : memref<128x128xf32, #tpu.memory_space<vmem>>, vector<128x128xf32>,
    return
  }
}

</mosaic_0001>

<bundles_post_ra>
// kernel: neg.2
= control target key start
LH: loop header
LB: loop body
LE: loop exit
PB: predicated region body
PF: predicated region fallthrough
CT: control target
= control target key end

     0   :  { %s40_s0 = inlined_call_operand.vmem [shape: f32[2,256], index: 0, kind: input, shape index: {}]   ;;  %s41_s1 = inlined_call_operand.vmem [shape: f32[2,256], index: 1, kind: output, shape index: {}]  }
   0x1   :  { %v2_v0 = vld [vmem:[%s40_s0] sm:$0x3]  ;;  %v16_v1 = vld [vmem:[%s40_s0 + $0x2] sm:$0x3] }
   0x2   :  { %v5_v2 = vxor.u32 2147483648, %v2_v0  ;;  %v12_v3 = vxor.u32 2147483648, %v16_v1 }
   0x4   :  { %7 = vst [vmem:[%s41_s1] sm:$0x3] %v5_v2  ;;  %17 = vst [vmem:[%s41_s1 + $0x2] sm:$0x3] %v12_v3 }

// kernel: point_refiner_forward.2
= control target key start
LH: loop header
LB: loop body
LE: loop exit
PB: predicated region body
PF: predicated region fallthrough
CT: control target
= control target key end

     0   :  { %v14_v1 = vlaneseq  ;;  %s54_s0 = inlined_call_operand.vmem [shape: f32[1,512], index: 0, kind: input, shape index: {}]   ;;  %s55_s1 = inlined_call_operand.vmem [shape: f32[1,512], index: 1, kind: output, shape index: {0}]   ;;  %s56_s2 = inlined_call_operand.vmem [shape: f32[1,512], index: 2, kind: output, shape index: {1}]  }
   0x1   :  { %v10_v0 = vld [vmem:[%s54_s0] sm:$0xf] }
   0x2   :  { %v11_v2 = vmul.f32 2.0, %v10_v0  ;;  %vm16_vm0 = vcmp.lt.s32.totalorder %v14_v1, 512 }
   0x4   :  { %v29_v3 = vadd.f32 -1.0, %v11_v2 }
   0x6   :  { %v13_v4 = vand.u32 2147483647, %v29_v3 }
   0x8   :  { %18 = vst.msk [vmem:[%s55_s1] sm:$0xf] %vm16_vm0, %v13_v4  ;;  %v19_v5 = vmul.f32 %v13_v4, %v10_v0 }
   0xa   :  { %20 = vst.msk [vmem:[%s56_s2] sm:$0xf] %vm16_vm0, %v19_v5 }

// kernel: squeeze.3
= control target key start
LH: loop header
LB: loop body
LE: loop exit
PB: predicated region body
PF: predicated region fallthrough
CT: control target
= control target key end

     0   :  { %vm7_vm0 = vcmask 523264   ;;  %s39_s0 = inlined_call_operand.vmem [shape: f32[128], index: 0, kind: input, shape index: {}]   ;;  %s40_s1 = inlined_call_operand.vmem [shape: f32[2,64], index: 1, kind: output, shape index: {}]  }
   0x1   :  { %v4_v0 = vld [vmem:[%s39_s0] sm:$0x1]  ;;  %s22_s0 = smov 64  }
   0x2   :  { %5 = vst [vmem:[#allocation1] sm:$0x1] %v4_v0 }
   0x9   :  { %v9_v1 = vld [vmem:[#allocation1] sm:$0x1]  }
   0xa   :  { %v6_v2 = vld [vmem:[#allocation1] sm:$0x1]   ;;  %10 = vrot.lane.b32.xlu0 %v9_v1, %s22_s0 }
   0xb   :  { %8 = vst.msk [vmem:[#allocation0] sm:$0x1] %vm7_vm0, %v6_v2  }
  0x7c   :  { %v11_v3 = vpop.permute.xlu0 %10  }
  0x7d   :  { %14 = vst.msk [vmem:[#allocation0 + $0x1] sm:$0x1] %vm7_vm0, %v11_v3  }
  0x84   :  { %v18_v4 = vld [vmem:[#allocation0] sm:$0x3] }
  0x85   :  { %20 = vst [vmem:[%s40_s1] sm:$0x3] %v18_v4 }

// kernel: point_refiner_forward.3
= control target key start
LH: loop header
LB: loop body
LE: loop exit
PB: predicated region body
PF: predicated region fallthrough
CT: control target
= control target key end

     0   :  { %vm46_vm0 = vcmask 64512   ;;  %s1107_s1 = inlined_call_operand.vmem [shape: f32[8,128], index: 1, kind: input, shape index: {}]   ;;  %s1108_s0 = inlined_call_operand.vmem [shape: f32[128,8], index: 0, kind: input, shape index: {}]   ;;  %s1109_s3 = inlined_call_operand.vmem [shape: f32[128,128], index: 3, kind: input, shape index: {}]   ;;  %s1110_s2 = inlined_call_operand.vmem [shape: f32[1,128], index: 2, kind: input, shape index: {}]   ;;  %s1111_s4 = inlined_call_operand.vmem [shape: f32[1,128], index: 4, kind: input, shape index: {}]   ;;  %s1112_s5 = inlined_call_operand.vmem [shape: f32[128,128], index: 5, kind: output, shape index: {0}]   ;;  %s1113_s6 = inlined_call_operand.vmem [shape: f32[128,128], index: 6, kind: output, shape index: {1}]  }
   0x1   :  { %v38_v0 = vld [vmem:[%s1107_s1] sm:$0xff]  ;;  %v23_v2 = vld [vmem:[%s1108_s0 + $0x8] sm:$0xff]  ;;  %v24_v3 = vld [vmem:[%s1108_s0 + $0x10] sm:$0xff] }
   0x2   :  { %v22_v1 = vld [vmem:[%s1108_s0] sm:$0xff]  ;;  %643 = vmatprep.subr.mxu0 %v38_v0  ;;  %v25_v4 = vld [vmem:[%s1108_s0 + $0x18] sm:$0xff]  ;;  %v257_v7 = vld [vmem:[%s1109_s3 + $0x8] sm:$0xff] }
   0x3   :  { %645 = vmatprep.mubr.msk.f32.mxu0 %vm46_vm0, %v22_v1  ;;  %644 = vmatpush3.msra.mxu0 %v38_v0  ;;  %v26_v5 = vld [vmem:[%s1108_s0 + $0x20] sm:$0xff]  ;;  %v258_v8 = vld [vmem:[%s1109_s3 + $0x10] sm:$0xff]  ;;  %v259_v9 = vld [vmem:[%s1109_s3 + $0x18] sm:$0xff] }
   0x4   :  { %646 = vmatmul.mubr.msk.f32.vlgmr.msra.gmra.mrb[0].mxu0 %vm46_vm0, %v23_v2  ;;  %v256_v6 = vld [vmem:[%s1109_s3] sm:$0xff]  ;;  %v729_v11 = vpack.c.bf16 %v259_v9, %v258_v8  ;;  %v27_v12 = vld [vmem:[%s1108_s0 + $0x28] sm:$0xff]  ;;  %v28_v15 = vld [vmem:[%s1108_s0 + $0x30] sm:$0xff] }
   0x5   :  { %648 = vmatprep.mubr.msk.f32.mxu0 %vm46_vm0, %v24_v3  ;;  %v725_v10 = vpack.c.bf16 %v257_v7, %v256_v6  ;;  %v260_v13 = vld [vmem:[%s1109_s3 + $0x20] sm:$0xff]  ;;  %v261_v14 = vld [vmem:[%s1109_s3 + $0x28] sm:$0xff]  ;;  %v29_v17 = vld [vmem:[%s1108_s0 + $0x38] sm:$0xff] }
   0x6   :  { %v733_v16 = vpack.c.bf16 %v261_v14, %v260_v13  ;;  %v262_v18 = vld [vmem:[%s1109_s3 + $0x30] sm:$0xff]  ;;  %v263_v19 = vld [vmem:[%s1109_s3 + $0x38] sm:$0xff]  ;;  %v30_v20 = vld [vmem:[%s1108_s0 + $0x40] sm:$0xff] }
   0x7   :  { %726 = vmatprep.subr.bf16.mxu0 %v725_v10  ;;  %757 = vmatprep.subr.bf16.mxu1 %v725_v10  ;;  %v737_v21 = vpack.c.bf16 %v263_v19, %v262_v18  ;;  %v31_v22 = vld [vmem:[%s1108_s0 + $0x48] sm:$0xff]  ;;  %v264_v23 = vld [vmem:[%s1109_s3 + $0x40] sm:$0xff]  ;;  %v32_v25 = vld [vmem:[%s1108_s0 + $0x50] sm:$0xff] }
   0x8   :  { %649 = vmatmul.mubr.msk.f32.gmra.mrb[2].mxu0 %vm46_vm0, %v25_v4  ;;  %765 = vmatpush3.bf16.msra.mxu1 %v725_v10  ;;  %v265_v24 = vld [vmem:[%s1109_s3 + $0x48] sm:$0xff]  ;;  %v33_v27 = vld [vmem:[%s1108_s0 + $0x58] sm:$0xff]  ;;  %v266_v28 = vld [vmem:[%s1109_s3 + $0x50] sm:$0xff] }
   0x9   :  { %651 = vmatprep.mubr.msk.f32.mxu0 %vm46_vm0, %v26_v5  ;;  %728 = vmatpush3.bf16.msra.mxu0 %v725_v10  ;;  %v741_v26 = vpack.c.bf16 %v265_v24, %v264_v23  ;;  %v267_v29 = vld [vmem:[%s1109_s3 + $0x58] sm:$0xff]  ;;  %v34_v30 = vld [vmem:[%s1108_s0 + $0x60] sm:$0xff]  ;;  %v35_v32 = vld [vmem:[%s1108_s0 + $0x68] sm:$0xff] }
   0xa   :  { %730 = vmatprep.subr.bf16.mxu0 %v729_v11  ;;  %758 = vmatprep.subr.bf16.mxu1 %v729_v11  ;;  %v745_v31 = vpack.c.bf16 %v267_v29, %v266_v28  ;;  %v268_v33 = vld [vmem:[%s1109_s3 + $0x60] sm:$0xff]  ;;  %v269_v34 = vld [vmem:[%s1109_s3 + $0x68] sm:$0xff]  ;;  %v36_v35 = vld [vmem:[%s1108_s0 + $0x70] sm:$0xff] }
   0xb   :  { %v749_v36 = vpack.c.bf16 %v269_v34, %v268_v33  ;;  %v37_v37 = vld [vmem:[%s1108_s0 + $0x78] sm:$0xff]  ;;  %v270_v38 = vld [vmem:[%s1109_s3 + $0x70] sm:$0xff]  ;;  %v560_v41 = vld [vmem:[%s1110_s2] ss:$0 sm:$0xff] }
   0xc   :  { %652 = vmatmul.mubr.msk.f32.gmra.mrb[4].mxu0 %vm46_vm0, %v27_v12  ;;  %766 = vmatpush3.bf16.msra.mxu1 %v729_v11  ;;  %v271_v39 = vld [vmem:[%s1109_s3 + $0x78] sm:$0xff] }
   0xd   :  { %654 = vmatprep.mubr.msk.f32.mxu0 %vm46_vm0, %v28_v15  ;;  %732 = vmatpush3.bf16.msra.mxu0 %v729_v11  ;;  %v753_v40 = vpack.c.bf16 %v271_v39, %v270_v38 }
   0xe   :  { %734 = vmatprep.subr.bf16.mxu0 %v733_v16  ;;  %759 = vmatprep.subr.bf16.mxu1 %v733_v16 }
  0x10   :  { %655 = vmatmul.mubr.msk.f32.gmra.mrb[6].mxu0 %vm46_vm0, %v29_v17  ;;  %767 = vmatpush3.bf16.msra.mxu1 %v733_v16 }
  0x11   :  { %657 = vmatprep.mubr.msk.f32.mxu0 %vm46_vm0, %v30_v20  ;;  %736 = vmatpush3.bf16.msra.mxu0 %v733_v16 }
  0x12   :  { %738 = vmatprep.subr.bf16.mxu0 %v737_v21  ;;  %760 = vmatprep.subr.bf16.mxu1 %v737_v21 }
  0x14   :  { %658 = vmatmul.mubr.msk.f32.gmra.mrb[8].mxu0 %vm46_vm0, %v31_v22  ;;  %768 = vmatpush3.bf16.msra.mxu1 %v737_v21 }
  0x15   :  { %660 = vmatprep.mubr.msk.f32.mxu0 %vm46_vm0, %v32_v25  ;;  %740 = vmatpush3.bf16.msra.mxu0 %v737_v21 }
  0x16   :  { %742 = vmatprep.subr.bf16.mxu0 %v741_v26  ;;  %761 = vmatprep.subr.bf16.mxu1 %v741_v26 }
  0x18   :  { %661 = vmatmul.mubr.msk.f32.gmra.mrb[10].mxu0 %vm46_vm0, %v33_v27  ;;  %769 = vmatpush3.bf16.msra.mxu1 %v741_v26 }
  0x19   :  { %663 = vmatprep.mubr.msk.f32.mxu0 %vm46_vm0, %v34_v30  ;;  %744 = vmatpush3.bf16.msra.mxu0 %v741_v26  ;;  %v993_v26 = vld [vmem:[%s1111_s4] ss:$0 sm:$0xff] }
  0x1a   :  { %746 = vmatprep.subr.bf16.mxu0 %v745_v31  ;;  %762 = vmatprep.subr.bf16.mxu1 %v745_v31 }
  0x1c   :  { %664 = vmatmul.mubr.msk.f32.gmra.mrb[12].mxu0 %vm46_vm0, %v35_v32  ;;  %770 = vmatpush3.bf16.msra.mxu1 %v745_v31 }
  0x1d   :  { %666 = vmatprep.mubr.msk.f32.mxu0 %vm46_vm0, %v36_v35  ;;  %748 = vmatpush3.bf16.msra.mxu0 %v745_v31 }
  0x1e   :  { %750 = vmatprep.subr.bf16.mxu0 %v749_v36  ;;  %763 = vmatprep.subr.bf16.mxu1 %v749_v36 }
  0x20   :  { %667 = vmatmul.mubr.msk.f32.gmra.mrb[14].mxu0 %vm46_vm0, %v37_v37  ;;  %771 = vmatpush3.bf16.msra.mxu1 %v749_v36 }
  0x21   :  { %752 = vmatpush3.bf16.msra.mxu0 %v749_v36  ;;  %764 = vmatprep.subr.bf16.mxu1 %v753_v40 }
  0x22   :  { %754 = vmatprep.subr.bf16.mxu0 %v753_v40 }
  0x24   :  { %772 = vmatpush3.bf16.msra.mxu1 %v753_v40 }
  0x25   :  { %756 = vmatpush3.bf16.msra.mxu0 %v753_v40 }
  0xd7   :  { %v647_v42 = vpop.f32.mrb[0].mxu0 }
  0xd8   :  { %v167_v43 = vadd.f32 %v647_v42, %v560_v41  ;;  %v161_v44 = vpop.f32.mrb[1].mxu0 }
  0xd9   :  { %v162_v45 = vadd.f32 %v560_v41, %v161_v44 }
  0xda   :  { %v241_v48 = vmax.f32 %v167_v43, 0.0 }
  0xdb   :  { %v240_v46 = vmax.f32 %v162_v45, 0.0  ;;  %v650_v47 = vpop.f32.mrb[2].mxu0 }
  0xdc   :  { %v177_v49 = vadd.f32 %v650_v47, %v560_v41  ;;  %v171_v50 = vpop.f32.mrb[3].mxu0 }
  0xdd   :  { %v172_v51 = vadd.f32 %v560_v41, %v171_v50  ;;  %701 = vmatprep.mubr.f32.mxu0 %v240_v46 }
  0xde   :  { %702 = vmatmul.mubr.f32.vlgmr.msra.gmra.mrb[16].mxu0 %v241_v48  ;;  %v243_v54 = vmax.f32 %v177_v49, 0.0 }
  0xdf   :  { %v242_v52 = vmax.f32 %v172_v51, 0.0  ;;  %v653_v53 = vpop.f32.mrb[4].mxu0 }
  0xe0   :  { %v187_v55 = vadd.f32 %v653_v53, %v560_v41  ;;  %v181_v56 = vpop.f32.mrb[5].mxu0 }
  0xe1   :  { %v182_v57 = vadd.f32 %v560_v41, %v181_v56  ;;  %704 = vmatprep.mubr.f32.mxu0 %v242_v52 }
  0xe2   :  { %705 = vmatmul.mubr.f32.gmra.mrb[18].mxu0 %v243_v54  ;;  %v245_v60 = vmax.f32 %v187_v55, 0.0 }
  0xe3   :  { %v244_v58 = vmax.f32 %v182_v57, 0.0  ;;  %v656_v59 = vpop.f32.mrb[6].mxu0 }
  0xe4   :  { %v197_v61 = vadd.f32 %v656_v59, %v560_v41  ;;  %v191_v62 = vpop.f32.mrb[7].mxu0 }
  0xe5   :  { %707 = vmatprep.mubr.f32.mxu0 %v244_v58  ;;  %v192_v63 = vadd.f32 %v560_v41, %v191_v62 }
  0xe6   :  { %708 = vmatmul.mubr.f32.gmra.mrb[20].mxu0 %v245_v60  ;;  %v247_v2 = vmax.f32 %v197_v61, 0.0 }
  0xe7   :  { %v659_v0 = vpop.f32.mrb[8].mxu0  ;;  %v246_v1 = vmax.f32 %v192_v63, 0.0 }
  0xe8   :  { %v207_v3 = vadd.f32 %v659_v0, %v560_v41  ;;  %v201_v4 = vpop.f32.mrb[9].mxu0 }
  0xe9   :  { %v202_v5 = vadd.f32 %v560_v41, %v201_v4  ;;  %710 = vmatprep.mubr.f32.mxu1 %v246_v1 }
  0xea   :  { %711 = vmatmul.mubr.f32.vlgmr.msra.gmra.mrb[0].mxu1 %v247_v2  ;;  %v249_v8 = vmax.f32 %v207_v3, 0.0 }
  0xeb   :  { %v248_v6 = vmax.f32 %v202_v5, 0.0  ;;  %v662_v7 = vpop.f32.mrb[10].mxu0 }
  0xec   :  { %v217_v9 = vadd.f32 %v662_v7, %v560_v41  ;;  %v211_v10 = vpop.f32.mrb[11].mxu0 }
  0xed   :  { %v212_v11 = vadd.f32 %v560_v41, %v211_v10  ;;  %713 = vmatprep.mubr.f32.mxu1 %v248_v6 }
  0xee   :  { %714 = vmatmul.mubr.f32.gmra.mrb[2].mxu1 %v249_v8  ;;  %v251_v14 = vmax.f32 %v217_v9, 0.0 }
  0xef   :  { %v250_v12 = vmax.f32 %v212_v11, 0.0  ;;  %v665_v13 = vpop.f32.mrb[12].mxu0 }
  0xf0   :  { %v227_v15 = vadd.f32 %v665_v13, %v560_v41  ;;  %v221_v16 = vpop.f32.mrb[13].mxu0 }
  0xf1   :  { %v222_v17 = vadd.f32 %v560_v41, %v221_v16  ;;  %716 = vmatprep.mubr.f32.mxu1 %v250_v12 }
  0xf2   :  { %717 = vmatmul.mubr.f32.gmra.mrb[4].mxu1 %v251_v14  ;;  %v253_v20 = vmax.f32 %v227_v15, 0.0 }
  0xf3   :  { %v252_v18 = vmax.f32 %v222_v17, 0.0  ;;  %v668_v19 = vpop.f32.mrb[14].mxu0 }
  0xf4   :  { %v237_v21 = vadd.f32 %v668_v19, %v560_v41  ;;  %v231_v22 = vpop.f32.mrb[15].mxu0 }
  0xf5   :  { %v232_v23 = vadd.f32 %v560_v41, %v231_v22  ;;  %719 = vmatprep.mubr.f32.mxu1 %v252_v18 }
  0xf6   :  { %720 = vmatmul.mubr.f32.gmra.mrb[6].mxu1 %v253_v20  ;;  %v255_v25 = vmax.f32 %v237_v21, 0.0 }
  0xf7   :  { %v254_v24 = vmax.f32 %v232_v23, 0.0 }
  0xf9   :  { %722 = vmatprep.mubr.f32.mxu1 %v254_v24 }
  0xfa   :  { %723 = vmatmul.mubr.f32.gmra.mrb[8].mxu1 %v255_v25 }
 0x1b1   :  { %v703_v27 = vpop.f32.mrb[16].mxu0 }
 0x1b2   :  { %v351_v28 = vadd.f32 %v703_v27, %v993_v26  ;;  %v345_v29 = vpop.f32.mrb[17].mxu0 }
 0x1b3   :  { %v346_v30 = vadd.f32 %v993_v26, %v345_v29 }
 0x1b4   :  { %425 = vst [vmem:[%s1112_s5 + $0x8] sm:$0xff] %v351_v28  ;;  %v579_v31 = vmul.f32 -1.442695, %v351_v28 }
 0x1b5   :  { %424 = vst [vmem:[%s1112_s5] sm:$0xff] %v346_v30  ;;  %v578_v32 = vmul.f32 -1.442695, %v346_v30  ;;  %v706_v33 = vpop.f32.mrb[18].mxu0 }
 0x1b6   :  { %773 = vpow2.f32 %v579_v31  ;;  %v361_v34 = vadd.f32 %v706_v33, %v993_v26  ;;  %v355_v35 = vpop.f32.mrb[19].mxu0 }
 0x1b7   :  { %775 = vpow2.f32 %v578_v32  ;;  %v356_v36 = vadd.f32 %v993_v26, %v355_v35 }
 0x1b8   :  { %427 = vst [vmem:[%s1112_s5 + $0x18] sm:$0xff] %v361_v34  ;;  %v581_v37 = vmul.f32 -1.442695, %v361_v34 }
 0x1b9   :  { %426 = vst [vmem:[%s1112_s5 + $0x10] sm:$0xff] %v356_v36  ;;  %v580_v38 = vmul.f32 -1.442695, %v356_v36  ;;  %v709_v39 = vpop.f32.mrb[20].mxu0 }
 0x1ba   :  { %777 = vpow2.f32 %v581_v37  ;;  %v371_v40 = vadd.f32 %v709_v39, %v993_v26  ;;  %v365_v41 = vpop.f32.mrb[21].mxu0 }
 0x1bb   :  { %779 = vpow2.f32 %v580_v38  ;;  %v366_v42 = vadd.f32 %v993_v26, %v365_v41 }
 0x1bc   :  { %429 = vst [vmem:[%s1112_s5 + $0x28] sm:$0xff] %v371_v40  ;;  %v583_v43 = vmul.f32 -1.442695, %v371_v40 }
 0x1bd   :  { %428 = vst [vmem:[%s1112_s5 + $0x20] sm:$0xff] %v366_v42  ;;  %v582_v44 = vmul.f32 -1.442695, %v366_v42  ;;  %v712_v45 = vpop.f32.mrb[0].mxu1 }
 0x1be   :  { %781 = vpow2.f32 %v583_v43  ;;  %v381_v46 = vadd.f32 %v712_v45, %v993_v26  ;;  %v375_v47 = vpop.f32.mrb[1].mxu1 }
 0x1bf   :  { %783 = vpow2.f32 %v582_v44  ;;  %v376_v48 = vadd.f32 %v993_v26, %v375_v47 }
 0x1c0   :  { %v774_v49 = vpop.eup %773  ;;  %431 = vst [vmem:[%s1112_s5 + $0x38] sm:$0xff] %v381_v46  ;;  %v585_v50 = vmul.f32 -1.442695, %v381_v46 }
 0x1c1   :  { %v776_v51 = vpop.eup %775  ;;  %v489_v52 = vadd.f32 1.0, %v774_v49  ;;  %430 = vst [vmem:[%s1112_s5 + $0x30] sm:$0xff] %v376_v48  ;;  %v584_v53 = vmul.f32 -1.442695, %v376_v48  ;;  %v715_v54 = vpop.f32.mrb[2].mxu1 }
 0x1c2   :  { %v488_v55 = vadd.f32 1.0, %v776_v51  ;;  %785 = vpow2.f32 %v585_v50  ;;  %v391_v56 = vadd.f32 %v715_v54, %v993_v26  ;;  %v385_v57 = vpop.f32.mrb[3].mxu1 }
 0x1c3   :  { %787 = vrcp.f32 %v489_v52  ;;  %v386_v58 = vadd.f32 %v993_v26, %v385_v57 }
 0x1c4   :  { %v778_v59 = vpop.eup %777  ;;  %789 = vrcp.f32 %v488_v55  ;;  %433 = vst [vmem:[%s1112_s5 + $0x48] sm:$0xff] %v391_v56  ;;  %v587_v60 = vmul.f32 -1.442695, %v391_v56 }
 0x1c5   :  { %v780_v61 = vpop.eup %779  ;;  %v491_v62 = vadd.f32 1.0, %v778_v59  ;;  %791 = vpow2.f32 %v584_v53  ;;  %432 = vst [vmem:[%s1112_s5 + $0x40] sm:$0xff] %v386_v58  ;;  %v586_v63 = vmul.f32 -1.442695, %v386_v58  ;;  %v718_v0 = vpop.f32.mrb[4].mxu1 }
 0x1c6   :  { %v490_v1 = vadd.f32 1.0, %v780_v61  ;;  %793 = vpow2.f32 %v587_v60  ;;  %v401_v2 = vadd.f32 %v718_v0, %v993_v26  ;;  %v395_v3 = vpop.f32.mrb[5].mxu1 }
 0x1c7   :  { %795 = vrcp.f32 %v491_v62  ;;  %v396_v4 = vadd.f32 %v993_v26, %v395_v3 }
 0x1c8   :  { %v782_v5 = vpop.eup %781  ;;  %797 = vrcp.f32 %v490_v1  ;;  %435 = vst [vmem:[%s1112_s5 + $0x58] sm:$0xff] %v401_v2  ;;  %v589_v6 = vmul.f32 -1.442695, %v401_v2 }
 0x1c9   :  { %v784_v7 = vpop.eup %783  ;;  %v493_v8 = vadd.f32 1.0, %v782_v5  ;;  %799 = vpow2.f32 %v586_v63  ;;  %434 = vst [vmem:[%s1112_s5 + $0x50] sm:$0xff] %v396_v4  ;;  %v588_v9 = vmul.f32 -1.442695, %v396_v4  ;;  %v721_v10 = vpop.f32.mrb[6].mxu1 }
 0x1ca   :  { %v492_v11 = vadd.f32 1.0, %v784_v7  ;;  %801 = vpow2.f32 %v589_v6  ;;  %v411_v12 = vadd.f32 %v721_v10, %v993_v26  ;;  %v405_v13 = vpop.f32.mrb[7].mxu1 }
 0x1cb   :  { %803 = vrcp.f32 %v493_v8  ;;  %v406_v14 = vadd.f32 %v993_v26, %v405_v13 }
 0x1cc   :  { %v786_v15 = vpop.eup %785  ;;  %805 = vrcp.f32 %v492_v11  ;;  %437 = vst [vmem:[%s1112_s5 + $0x68] sm:$0xff] %v411_v12  ;;  %v591_v16 = vmul.f32 -1.442695, %v411_v12 }
 0x1cd   :  { %v788_v17 = vpop.eup %787  ;;  %v495_v18 = vadd.f32 1.0, %v786_v15  ;;  %807 = vpow2.f32 %v588_v9  ;;  %436 = vst [vmem:[%s1112_s5 + $0x60] sm:$0xff] %v406_v14  ;;  %v590_v19 = vmul.f32 -1.442695, %v406_v14  ;;  %v724_v20 = vpop.f32.mrb[8].mxu1 }
 0x1ce   :  { %v790_v21 = vpop.eup %789  ;;  %537 = vst [vmem:[%s1113_s6 + $0x8] sm:$0xff] %v788_v17  ;;  %809 = vpow2.f32 %v591_v16  ;;  %v421_v22 = vadd.f32 %v724_v20, %v993_v26  ;;  %v415_v23 = vpop.f32.mrb[9].mxu1 }
 0x1cf   :  { %v792_v24 = vpop.eup %791  ;;  %536 = vst [vmem:[%s1113_s6] sm:$0xff] %v790_v21  ;;  %811 = vrcp.f32 %v495_v18  ;;  %v416_v25 = vadd.f32 %v993_v26, %v415_v23 }
 0x1d0   :  { %v794_v27 = vpop.eup %793  ;;  %v494_v28 = vadd.f32 1.0, %v792_v24  ;;  %813 = vpow2.f32 %v590_v19  ;;  %439 = vst [vmem:[%s1112_s5 + $0x78] sm:$0xff] %v421_v22  ;;  %v593_v29 = vmul.f32 -1.442695, %v421_v22 }
 0x1d1   :  { %v796_v30 = vpop.eup %795  ;;  %v497_v31 = vadd.f32 1.0, %v794_v27  ;;  %438 = vst [vmem:[%s1112_s5 + $0x70] sm:$0xff] %v416_v25  ;;  %v592_v32 = vmul.f32 -1.442695, %v416_v25 }
 0x1d2   :  { %v798_v33 = vpop.eup %797  ;;  %539 = vst [vmem:[%s1113_s6 + $0x18] sm:$0xff] %v796_v30  ;;  %815 = vrcp.f32 %v494_v28 }
 0x1d3   :  { %v800_v26 = vpop.eup %799  ;;  %538 = vst [vmem:[%s1113_s6 + $0x10] sm:$0xff] %v798_v33  ;;  %817 = vrcp.f32 %v497_v31 }
 0x1d4   :  { %v802_v34 = vpop.eup %801  ;;  %v496_v35 = vadd.f32 1.0, %v800_v26  ;;  %819 = vpow2.f32 %v593_v29 }
 0x1d5   :  { %v804_v36 = vpop.eup %803  ;;  %v499_v37 = vadd.f32 1.0, %v802_v34  ;;  %821 = vpow2.f32 %v592_v32 }
 0x1d6   :  { %v806_v38 = vpop.eup %805  ;;  %541 = vst [vmem:[%s1113_s6 + $0x28] sm:$0xff] %v804_v36  ;;  %823 = vrcp.f32 %v496_v35 }
 0x1d7   :  { %v808_v39 = vpop.eup %807  ;;  %540 = vst [vmem:[%s1113_s6 + $0x20] sm:$0xff] %v806_v38  ;;  %825 = vrcp.f32 %v499_v37 }
 0x1d8   :  { %v810_v40 = vpop.eup %809  ;;  %v498_v41 = vadd.f32 1.0, %v808_v39 }
 0x1d9   :  { %v812_v42 = vpop.eup %811  ;;  %v501_v43 = vadd.f32 1.0, %v810_v40 }
 0x1da   :  { %v814_v44 = vpop.eup %813  ;;  %543 = vst [vmem:[%s1113_s6 + $0x38] sm:$0xff] %v812_v42  ;;  %827 = vrcp.f32 %v498_v41 }
 0x1db   :  { %829 = vrcp.f32 %v501_v43  ;;  %v500_v45 = vadd.f32 1.0, %v814_v44 }
 0x1dc   :  { %v816_v46 = vpop.eup %815 }
 0x1dd   :  { %v818_v47 = vpop.eup %817  ;;  %542 = vst [vmem:[%s1113_s6 + $0x30] sm:$0xff] %v816_v46  ;;  %831 = vrcp.f32 %v500_v45 }
 0x1de   :  { %v820_v48 = vpop.eup %819  ;;  %545 = vst [vmem:[%s1113_s6 + $0x48] sm:$0xff] %v818_v47 }
 0x1df   :  { %v822_v49 = vpop.eup %821  ;;  %v503_v50 = vadd.f32 1.0, %v820_v48 }
 0x1e0   :  { %v824_v51 = vpop.eup %823  ;;  %v502_v52 = vadd.f32 1.0, %v822_v49 }
 0x1e1   :  { %v826_v53 = vpop.eup %825  ;;  %544 = vst [vmem:[%s1113_s6 + $0x40] sm:$0xff] %v824_v51  ;;  %833 = vrcp.f32 %v503_v50 }
 0x1e2   :  { %547 = vst [vmem:[%s1113_s6 + $0x58] sm:$0xff] %v826_v53  ;;  %835 = vrcp.f32 %v502_v52 }
 0x1e4   :  { %v828_v54 = vpop.eup %827 }
 0x1e5   :  { %v830_v55 = vpop.eup %829  ;;  %546 = vst [vmem:[%s1113_s6 + $0x50] sm:$0xff] %v828_v54 }
 0x1e6   :  { %549 = vst [vmem:[%s1113_s6 + $0x68] sm:$0xff] %v830_v55 }
 0x1e7   :  { %v832_v56 = vpop.eup %831 }
 0x1e8   :  { %548 = vst [vmem:[%s1113_s6 + $0x60] sm:$0xff] %v832_v56 }
 0x1eb   :  { %v834_v57 = vpop.eup %833 }
 0x1ec   :  { %v836_v58 = vpop.eup %835  ;;  %551 = vst [vmem:[%s1113_s6 + $0x78] sm:$0xff] %v834_v57 }
 0x1ed   :  { %550 = vst [vmem:[%s1113_s6 + $0x70] sm:$0xff] %v836_v58 }

// kernel: squeeze.2
= control target key start
LH: loop header
LB: loop body
LE: loop exit
PB: predicated region body
PF: predicated region fallthrough
CT: control target
= control target key end

     0   :  { %s85_s0 = inlined_call_operand.vmem [shape: f32[128], index: 0, kind: input, shape index: {}]   ;;  %s86_s1 = inlined_call_operand.hbm [shape: f32[2,64,1], index: 1, kind: output, shape index: {}]  }
   0x1   :  { %v5_v0 = vld [vmem:[%s85_s0] sm:$0x1] }
   0x2   :  { %2 = vsyncpa [#allocation1], 0  ;;  %6 = vst [vmem:[#allocation3] sm:$0x1] %v5_v0  ;;  %vm8_vm0 = vcmask 523264   ;;  %s58_s0 = smov 64  }
   0x3   :  { %s59_s8 = smov [#allocation0]  }
   0x4   :  { %s26_s9 = sshll.u32 %s59_s8, 4  ;;  %s27_s9 = int_to_ptr.vmem [resolvable:$true] %s26_s9 }
   0x5   :  { %s34_s10 = scalar_lea.vmem %s27_s9, 32  ;;  %p39_p1 = scmp.lt.s32.totalorder %s27_s9, %s27_s9 }
   0x6   :  { %p35_p0 = scmp.ne.s32.totalorder %s27_s9, %s34_s10  ;;  %p40_p2 = scmp.lt.s32.totalorder %s34_s10, %s34_s10 }
   0x8   :  { %p41_p3 = por %p40_p2, %p39_p1 }
   0x9   :  { %v10_v1 = vld [vmem:[#allocation3] sm:$0x1]  }
   0xa   :  { %v7_v2 = vld [vmem:[#allocation3] sm:$0x1]   ;;  %11 = vrot.lane.b32.xlu0 %v10_v1, %s58_s0  ;;  %p42_p4 = pnand %p41_p3, %p35_p0 }
   0xb   :  { %9 = vst.msk [vmem:[#allocation2] sm:$0x1] %vm8_vm0, %v7_v2  }
  0x7c   :  { %v12_v3 = vpop.permute.xlu0 %11  }
  0x7d   :  { %15 = vst.msk [vmem:[#allocation2 + $0x1] sm:$0x1] %vm8_vm0, %v12_v3  }
  0x84   :  { %v19_v4 = vld [vmem:[#allocation2] sm:$0x3] }
  0x85   :  { %21 = vst [vmem:[#allocation0] sm:$0x3] %v19_v4 }
  0x86   :  { %45 = shalt.err (!%p42_p4)
}
  0x87   :  { %s46_s13 = scalar_lea.hbm %s86_s1, 32 }
  0x88   :  { %p47_p5 = scmp.ne.s32.totalorder %s86_s1, %s46_s13  ;;  %p50_p6 = scmp.lt.u32.totalorder %s46_s13, %s86_s1 }
  0x8a   :  { %p52_p7 = pnand %p50_p6, %p47_p5 }
  0x8c   :  { %55 = shalt.err (!%p52_p7)
}
  0x8d   :  { %29 = dma.vmem_to_hbm [thread:$0]  %s27_s9, 32, %s86_s1, [#allocation1]  }
  0x8e   :  { %56 = dma.done.wait [#allocation1], 32  }
  0x8f   :  { %57 = vsyncadd [#allocation1], 4294967264 }
  0x90   :  { %31 = vsyncpa [#allocation1], 1 }

</bundles_post_ra>
